<compile_context>
chip_gen: v5e
topology: v5e:2x2
jax: 0.10.0
libtpu: 0.0.40
codegen_flags: <defaults>
</compile_context>

<pallas_src>
import functools

import jax
import jax.numpy as jnp
from jax.experimental import pallas as pl
from jax.experimental.pallas import tpu as pltpu

D_MODEL = 768          # fixed by nn.Linear(768, num_labels)
TAG_PAD = 128          # tag axis padded to one full lane group
NEG_PAD = -1e9         # score for padded tag lanes (exp underflows to exactly 0)
IMPOSSIBLE = -1e5      # partial-CRF "impossible tag" score
MASKED = -2            # packed tag code for mask==0 / padding timesteps


def _round_up(x, m):
    return (x + m - 1) // m * m


# ---------------------------------------------------------------------------
# Kernel 1: fully-connected projection  logits = h @ W_pad + b_pad  (bf16 out)
# ---------------------------------------------------------------------------
def _fc_kernel(h_ref, w_ref, b_ref, o_ref):
    acc = jnp.dot(h_ref[...], w_ref[...], preferred_element_type=jnp.float32)
    o_ref[...] = (acc + b_ref[...]).astype(o_ref.dtype)


def fc_project(h, w_pad_bf16, b_pad, *, tm=1024):
    """h: (..., D) -> padded logits (..., TAG_PAD) bf16.

    Padded tag lanes come out as NEG_PAD (folded into the bias)."""
    lead = h.shape[:-1]
    D = h.shape[-1]
    M = 1
    for s in lead:
        M *= s
    TM = min(tm, _round_up(M, 8))      # rows/tile; either full array or 1024
    Mp = _round_up(M, TM)
    h2 = h.reshape(M, D).astype(jnp.bfloat16)
    if Mp != M:
        h2 = jnp.pad(h2, ((0, Mp - M), (0, 0)))

    out = pl.pallas_call(
        _fc_kernel,
        out_shape=jax.ShapeDtypeStruct((Mp, TAG_PAD), jnp.bfloat16),
        grid=(Mp // TM,),
        in_specs=[
            pl.BlockSpec((TM, D), lambda i: (i, 0)),          # activations, tiled
            pl.BlockSpec((D, TAG_PAD), lambda i: (0, 0)),     # weights, resident
            pl.BlockSpec((1, TAG_PAD), lambda i: (0, 0)),     # bias, resident
        ],
        out_specs=pl.BlockSpec((TM, TAG_PAD), lambda i: (i, 0)),
        compiler_params=pltpu.CompilerParams(
            dimension_semantics=("parallel",),
            vmem_limit_bytes=32 * 1024 * 1024,
        ),
    )(h2, w_pad_bf16, b_pad)
    return out[:M].reshape(*lead, TAG_PAD)


# ---------------------------------------------------------------------------
# Kernel 2: partial/fuzzy CRF forward algorithm (both lattices in one pass).
# Grid: chunks of TL timesteps; alpha_den / alpha_num carried in the outputs.
# t = 0 is initialised outside (its in-chunk tcode is MASKED -> no-op step),
# so the inner loop has static bounds and can be unrolled.
# ---------------------------------------------------------------------------
def _crf_fwd_kernel(emis_ref, tcode_ref, exp_trans_ref, a0_den_ref, a0_num_ref,
                    aden_ref, anum_ref, *, num_labels, unroll):
    c = pl.program_id(0)
    TL, B, Tp = emis_ref.shape

    @pl.when(c == 0)
    def _():
        aden_ref[...] = a0_den_ref[...]
        anum_ref[...] = a0_num_ref[...]

    exp_trans = exp_trans_ref[...]                       # (Tp, Tp) bf16, hoisted
    lane = jax.lax.broadcasted_iota(jnp.int32, (B, Tp), 1)
    valid = lane < num_labels

    def advance(a, em):
        # logsumexp over the "from" axis via MXU: m + log(exp(a - m) @ exp(trans)) + em
        m = jnp.max(a, axis=-1, keepdims=True)
        p = jnp.exp(a - m).astype(jnp.bfloat16)          # in [0, 1], bf16-safe
        s = jnp.dot(p, exp_trans, preferred_element_type=jnp.float32)
        return m + jnp.log(s) + em

    def step(t, carry):
        a_den, a_num = carry
        e = emis_ref[t].astype(jnp.float32)              # (B, Tp); padded lanes ~ NEG_PAD
        tcode = tcode_ref[t]                             # (B, 1) int32; MASKED => skip
        pos = jnp.logical_and(jnp.logical_or(tcode == lane, tcode < 0), valid)
        e_num = e + (1.0 - pos.astype(jnp.float32)) * IMPOSSIBLE
        keep = tcode > MASKED                            # (B, 1) bool
        new_den = advance(a_den, e)                      # two independent chains:
        new_num = advance(a_num, e_num)                  # scheduler overlaps MXU/EUP
        # select (not arithmetic blend): padded lanes may be -inf, avoid 0*inf NaN.
        return (jnp.where(keep, new_den, a_den),
                jnp.where(keep, new_num, a_num))

    a_den, a_num = jax.lax.fori_loop(0, TL, step,
                                     (aden_ref[...], anum_ref[...]),
                                     unroll=unroll)
    aden_ref[...] = a_den
    anum_ref[...] = a_num


def crf_nll(emis_t, tags, mask, trans, start, end, num_labels, *, tl=256, unroll=4):
    """emis_t: (L, B, TAG_PAD) bf16 time-major, NEG_PAD in padded lanes;
    tags/mask: (B, L) int. Returns scalar nll.  Assumes mask[:, 0] == 1."""
    L, B, Tp = emis_t.shape

    tags_i = tags.astype(jnp.int32)
    mask_i = mask.astype(jnp.int32)
    # Pack tag + mask into one code; mark t = 0 as MASKED since it is handled below.
    tcode = jnp.where(mask_i > 0, tags_i, MASKED)                       # (B, L)
    tcode_k = tcode.at[:, 0].set(MASKED).T[:, :, None]                  # (L, B, 1)

    lane = jnp.arange(Tp)[None, :]
    valid = lane < num_labels
    start_p = jnp.full((1, Tp), NEG_PAD, jnp.float32).at[0, :num_labels].set(start)

    # Hoisted t = 0 initialisation (tiny (B, 128) XLA op).
    e0 = emis_t[0].astype(jnp.float32)                                  # (B, Tp)
    t0 = tags_i[:, 0:1]
    p0 = jnp.logical_and(jnp.logical_or(t0 == lane, t0 < 0), valid).astype(jnp.float32)
    a0_den = start_p + e0
    a0_num = a0_den + (1.0 - p0) * IMPOSSIBLE

    exp_trans = (jnp.zeros((Tp, Tp), jnp.float32)
                 .at[:num_labels, :num_labels].set(jnp.exp(trans))
                 ).astype(jnp.bfloat16)

    TL = min(tl, L)
    Lp = _round_up(L, TL)
    emis_k = emis_t
    if Lp != L:
        emis_k = jnp.pad(emis_k, ((0, Lp - L), (0, 0), (0, 0)))
        tcode_k = jnp.pad(tcode_k, ((0, Lp - L), (0, 0), (0, 0)),
                          constant_values=MASKED)                        # no-op steps

    aden, anum = pl.pallas_call(
        functools.partial(_crf_fwd_kernel, num_labels=num_labels, unroll=unroll),
        out_shape=(jax.ShapeDtypeStruct((B, Tp), jnp.float32),
                   jax.ShapeDtypeStruct((B, Tp), jnp.float32)),
        grid=(Lp // TL,),
        in_specs=[
            pl.BlockSpec((TL, B, Tp), lambda c: (c, 0, 0)),   # emissions chunk (bf16)
            pl.BlockSpec((TL, B, 1), lambda c: (c, 0, 0)),    # packed tag/mask chunk
            pl.BlockSpec((Tp, Tp), lambda c: (0, 0)),         # exp(trans), resident
            pl.BlockSpec((B, Tp), lambda c: (0, 0)),          # alpha_den init, resident
            pl.BlockSpec((B, Tp), lambda c: (0, 0)),          # alpha_num init, resident
        ],
        out_specs=(pl.BlockSpec((B, Tp), lambda c: (0, 0)),   # alpha_den (carried)
                   pl.BlockSpec((B, Tp), lambda c: (0, 0))),  # alpha_num (carried)
        compiler_params=pltpu.CompilerParams(
            dimension_semantics=("arbitrary",),
            vmem_limit_bytes=32 * 1024 * 1024,
        ),
    )(emis_k, tcode_k, exp_trans, a0_den, a0_num)

    lse = jax.scipy.special.logsumexp
    den = lse(aden[:, :num_labels] + end[None, :], axis=-1)   # (B,)
    num = lse(anum[:, :num_labels] + end[None, :], axis=-1)   # (B,)
    return jnp.sum(den - num)


# ---------------------------------------------------------------------------
# NER.forward equivalent
# ---------------------------------------------------------------------------
def ner_forward(params, inputs, outputs):
    masks = jnp.squeeze(inputs["attention_mask"], 1)        # (B, L)
    input_ids = jnp.squeeze(inputs["input_ids"], 1)          # (B, L)

    # TODO(synk): pretrained RoBERTa/Camembert/Longformer encoder (loaded from
    # lm_path) has no in-script equivalent; deterministic embedding lookup
    # stands in for `transformer(...).last_hidden_state`.
    # Time-major gather so the FC output reshapes directly to (L, B, TAG_PAD)
    # emissions -> no logits transpose / extra HBM round trip before the CRF.
    h_t = params["embedding"][input_ids.T]                   # (L, B, 768)

    # dropout(p=0.2) is identity in eval mode.
    emis_t = fc_project(h_t, params["fc_w_pad"], params["fc_b_pad"])  # (L, B, 128) bf16
    nll = crf_nll(emis_t, outputs, masks,
                  params["crf_trans"], params["crf_start"], params["crf_end"],
                  params["num_labels"])
    return nll, h_t, emis_t


# ---------------------------------------------------------------------------
# Pure-JAX reference for the CRF NLL (unpadded tag axis, batch-major logits)
# ---------------------------------------------------------------------------
def reference_crf_nll(logits, tags, mask, trans, start, end):
    lse = jax.scipy.special.logsumexp
    B, L, T = logits.shape
    maskf = mask.astype(jnp.float32)

    a = start[None, :] + logits[:, 0]
    for i in range(1, L):
        inner = a[:, :, None] + trans[None] + logits[:, i][:, None, :]
        m = maskf[:, i][:, None]
        a = m * lse(inner, axis=1) + (1.0 - m) * a
    den = lse(a + end[None, :], axis=1)

    poss = ((tags[..., None] == jnp.arange(T)[None, None, :]) |
            (tags[..., None] < 0)).astype(jnp.float32)
    e_num = logits + (1.0 - poss) * IMPOSSIBLE
    a = start[None, :] + e_num[:, 0]
    for i in range(1, L):
        inner = a[:, :, None] + trans[None] + e_num[:, i][:, None, :]
        m = maskf[:, i][:, None]
        a = m * lse(inner, axis=1) + (1.0 - m) * a
    num = lse(a + end[None, :], axis=1)
    return jnp.sum(den - num)


if __name__ == "__main__":
    B, L = 2, 10
    num_labels = 9
    vocab = 64

    keys = jax.random.split(jax.random.PRNGKey(0), 8)

    # Deterministic parameter init (shapes from NER.__init__).
    embedding = jax.random.normal(keys[0], (vocab, D_MODEL), jnp.float32) * 0.02
    bound = 1.0 / (D_MODEL ** 0.5)
    fc_w = jax.random.uniform(keys[1], (num_labels, D_MODEL), jnp.float32, -bound, bound)
    fc_b = jax.random.uniform(keys[2], (num_labels,), jnp.float32, -bound, bound)
    crf_trans = jax.random.uniform(keys[3], (num_labels, num_labels), jnp.float32, -0.1, 0.1)
    crf_start = jax.random.uniform(keys[4], (num_labels,), jnp.float32, -0.1, 0.1)
    crf_end = jax.random.uniform(keys[5], (num_labels,), jnp.float32, -0.1, 0.1)

    # Weights in bf16 for the MXU path; lane-padding folded into the bias.
    fc_w_pad = (jnp.zeros((D_MODEL, TAG_PAD), jnp.bfloat16)
                .at[:, :num_labels].set(fc_w.T.astype(jnp.bfloat16)))
    fc_b_pad = (jnp.full((1, TAG_PAD), NEG_PAD, jnp.float32)
                .at[0, :num_labels].set(fc_b))

    params = dict(embedding=embedding, fc_w_pad=fc_w_pad, fc_b_pad=fc_b_pad,
                  crf_trans=crf_trans, crf_start=crf_start, crf_end=crf_end,
                  num_labels=num_labels)

    # Example inputs (HF tokenizer layout: (B, 1, L) before .squeeze(1)).
    input_ids = jax.random.randint(keys[6], (B, 1, L), 0, vocab, dtype=jnp.int32)
    lengths = jnp.array([L, L - 3], dtype=jnp.int32)
    attention_mask = (jnp.arange(L)[None, None, :] <
                      lengths[:, None, None]).astype(jnp.int32)          # (B, 1, L)
    tags = jax.random.randint(keys[7], (B, L), -1, num_labels, dtype=jnp.int32)  # -1 = unlabeled

    inputs = {"input_ids": input_ids, "attention_mask": attention_mask}

    nll, h_t, emis_t = ner_forward(params, inputs, tags)
    nll = jax.block_until_ready(nll)

    # --- correctness checks against plain-JAX references ---
    masks = jnp.squeeze(attention_mask, 1)
    logits_kernel_t = emis_t[..., :num_labels].astype(jnp.float32)      # (L, B, 9)
    logits_ref_t = h_t @ fc_w.T + fc_b                                   # (L, B, 9)
    # bf16 activations/weights/output -> relaxed tolerance vs f32 Linear.
    assert bool(jnp.allclose(logits_kernel_t, logits_ref_t, rtol=2e-2, atol=2e-2)), \
        "FC kernel mismatch"
    # Padded lanes must carry the folded NEG_PAD bias.
    assert bool(jnp.all(emis_t[..., num_labels:].astype(jnp.float32) < -1e8)), \
        "bias fold broken"

    logits_kernel = jnp.transpose(logits_kernel_t, (1, 0, 2))            # (B, L, 9)
    nll_ref = reference_crf_nll(logits_kernel, tags, masks,
                                crf_trans, crf_start, crf_end)
    assert bool(jnp.isfinite(nll)), "nll not finite"
    # bf16 exp-space matmul in the CRF -> slightly relaxed NLL tolerance.
    assert bool(jnp.allclose(nll, nll_ref, rtol=1e-2, atol=1e-1)), \
        f"CRF NLL mismatch: kernel={float(nll)} ref={float(nll_ref)}"

    print("KERNEL_OK")
</pallas_src>

<mosaic_0001>
module attributes {stable_mosaic.version = 11 : i64} {
  func.func @_fc_kernel(%arg0: i32, %arg1: memref<24x768xbf16, #tpu.memory_space<vmem>>, %arg2: memref<768x128xbf16, #tpu.memory_space<vmem>>, %arg3: memref<1x128xf32, #tpu.memory_space<vmem>>, %arg4: memref<24x128xbf16, #tpu.memory_space<vmem>>) attributes {dimension_semantics = [#tpu.dimension_semantics<parallel>], iteration_bounds = array<i64: 1>, scalar_prefetch = 0 : i64, scratch_operands = 0 : i64, tpu.core_type = #tpu.core_type<tc>, window_params = [{transform_indices = @transform_0, window_bounds = array<i64: 24, 768>}, {pipeline_mode = #tpu.pipeline_mode<synchronous>, transform_indices = @transform_1, window_bounds = array<i64: 768, 128>}, {pipeline_mode = #tpu.pipeline_mode<synchronous>, transform_indices = @transform_2, window_bounds = array<i64: 1, 128>}, {transform_indices = @transform_3, window_bounds = array<i64: 24, 128>}]} {
    %c0 = arith.constant 0 : index
    %c0_0 = arith.constant 0 : index
    %0 = vector.load %arg1[%c0, %c0_0] : memref<24x768xbf16, #tpu.memory_space<vmem>>, vector<24x768xbf16>
    %c0_1 = arith.constant 0 : index
    %c0_2 = arith.constant 0 : index
    %1 = vector.load %arg2[%c0_1, %c0_2] : memref<768x128xbf16, #tpu.memory_space<vmem>>, vector<768x128xbf16>
    %cst = arith.constant dense<0.000000e+00> : vector<24x128xf32>
    %2 = tpu.matmul %0, %1, %cst {dimension_numbers = #tpu.dot_dimension_numbers<[1], [0], [0], [1], [0, 0, 1, 1], [], []>} : vector<24x768xbf16>, vector<768x128xbf16>, vector<24x128xf32> -> vector<24x128xf32>
    %c0_3 = arith.constant 0 : index
    %c0_4 = arith.constant 0 : index
    %3 = vector.load %arg3[%c0_3, %c0_4] : memref<1x128xf32, #tpu.memory_space<vmem>>, vector<1x128xf32>
    %4 = vector.broadcast %3 : vector<1x128xf32> to vector<24x128xf32>
    %5 = arith.addf %2, %4 : vector<24x128xf32>
    %6 = arith.truncf %5 : vector<24x128xf32> to vector<24x128xbf16>
    %c0_5 = arith.constant 0 : index
    %c0_6 = arith.constant 0 : index
    %7 = vector.load %arg4[%c0_5, %c0_6] : memref<24x128xbf16, #tpu.memory_space<vmem>>, vector<24x128xbf16>
    tpu.vector_store %arg4[%c0_5, %c0_6], %6 {strides = array<i32>} : memref<24x128xbf16, #tpu.memory_space<vmem>>, vector<24x128xbf16>,
    return
  }
  func.func @transform_0(%arg0: i32) -> (i32, i32) {
    %c0_i32 = arith.constant 0 : i32
    %c0_i32_0 = arith.constant 0 : i32
    return %arg0, %c0_i32 : i32, i32
  }
  func.func @transform_1(%arg0: i32) -> (i32, i32) {
    %c0_i32 = arith.constant 0 : i32
    %c0_i32_0 = arith.constant 0 : i32
    %c0_i32_1 = arith.constant 0 : i32
    return %c0_i32, %c0_i32_0 : i32, i32
  }
  func.func @transform_2(%arg0: i32) -> (i32, i32) {
    %c0_i32 = arith.constant 0 : i32
    %c0_i32_0 = arith.constant 0 : i32
    %c0_i32_1 = arith.constant 0 : i32
    return %c0_i32, %c0_i32_0 : i32, i32
  }
  func.func @transform_3(%arg0: i32) -> (i32, i32) {
    %c0_i32 = arith.constant 0 : i32
    %c0_i32_0 = arith.constant 0 : i32
    return %arg0, %c0_i32 : i32, i32
  }
}

</mosaic_0001>

<bundles_post_ra>
// kernel: tpu_custom_call.1
= control target key start
LH: loop header
LB: loop body
LE: loop exit
PB: predicated region body
PF: predicated region fallthrough
CT: control target
= control target key end

     0   :  { %8 = vsyncpa [#allocation3], 0  ;;  %s1051_s0 = inlined_call_operand.hbm [shape: bf16[24,768], index: 0, kind: input, shape index: {}]   ;;  %s1052_s1 = inlined_call_operand.hbm [shape: bf16[768,128], index: 1, kind: input, shape index: {}]   ;;  %s1053_s2 = inlined_call_operand.vmem [shape: f32[1,128], index: 2, kind: input, shape index: {}]   ;;  %s1054_s3 = inlined_call_operand.hbm [shape: bf16[24,128], index: 3, kind: output, shape index: {}]  }
   0x1   :  { %9 = vsyncpa [#allocation6], 0 }
   0x2   :  { %10 = vsyncpa [#allocation4], 0  ;;  %s15_s14 = sshll.u32 %s1051_s0, 4  ;;  %s1006_s15 = smov [#allocation2]   ;;  %s16_s14 = int_to_ptr.hbm [resolvable:$true] %s15_s14 }
   0x3   :  { %s17_s16 = sshll.u32 %s1006_s15, 4  ;;  %s28_s19 = sshll.u32 %s1052_s1, 4  ;;  %s18_s16 = int_to_ptr.vmem [resolvable:$true] %s17_s16  ;;  %s29_s19 = int_to_ptr.hbm [resolvable:$true] %s28_s19 }
   0x4   :  { %s1007_s20 = smov 384   ;;  %s1008_s21 = smov 24  }
   0x5   :  { %23 = dma.hbm_to_vmem [thread:$0]  %s16_s14, 1152, %s18_s16, [#allocation3], %s1007_s20, %s1007_s20, %s1008_s21  }
   0x6   :  { %s1009_s22 = smov [#allocation5]   ;;  %s1010_s24 = smov 64  }
   0x7   :  { %s30_s23 = sshll.u32 %s1009_s22, 4  ;;  %s1011_s25 = smov 4   ;;  %s31_s23 = int_to_ptr.vmem [resolvable:$true] %s30_s23 }
   0x8   :  { %36 = dma.hbm_to_vmem [thread:$0]  %s29_s19, 6144, %s31_s23, [#allocation6], %s1010_s24, %s1010_s24, %s1011_s25  }
   0x9   :  { %1000 = dma.done.wait [#allocation3], 1152  }
   0xa   :  { %1001 = vsyncadd [#allocation3], 4294966144 }
   0xb   :  { %1002 = dma.done.wait [#allocation6], 6144  }
   0xc   :  { %1003 = vsyncadd [#allocation6], 4294961152  ;;  %v858_v0 = vld [vmem:[#allocation5 + $0x38] sm:$0xff]  ;;  %v857_v4 = vld [vmem:[#allocation5 + $0x30] sm:$0xff]  ;;  %s615_s29 = sshll.u32 %s1054_s3, 4  ;;  %s616_s29 = int_to_ptr.hbm [resolvable:$true] %s615_s29 }
   0xd   :  { %v866_v1 = vld [vmem:[#allocation5 + $0x78] sm:$0xff]  ;;  %495 = vmatpush.bf16.msra.mxu0 %v858_v0  ;;  %v865_v5 = vld [vmem:[#allocation5 + $0x70] sm:$0xff]  ;;  %v856_v8 = vld [vmem:[#allocation5 + $0x28] sm:$0xff] }
   0xe   :  { %v874_v2 = vld [vmem:[#allocation5 + $0xb8] sm:$0xff]  ;;  %513 = vmatpush.bf16.msra.mxu1 %v866_v1  ;;  %v873_v6 = vld [vmem:[#allocation5 + $0xb0] sm:$0xff]  ;;  %v864_v9 = vld [vmem:[#allocation5 + $0x68] sm:$0xff] }
   0xf   :  { %v882_v3 = vld [vmem:[#allocation5 + $0xf8] sm:$0xff]  ;;  %531 = vmatpush.bf16.msra.mxu2 %v874_v2  ;;  %v881_v7 = vld [vmem:[#allocation5 + $0xf0] sm:$0xff]  ;;  %v872_v10 = vld [vmem:[#allocation5 + $0xa8] sm:$0xff] }
  0x10   :  { %549 = vmatpush.bf16.msra.mxu3 %v882_v3  ;;  %v880_v11 = vld [vmem:[#allocation5 + $0xe8] sm:$0xff]  ;;  %v855_v12 = vld [vmem:[#allocation5 + $0x20] sm:$0xff]  ;;  %v854_v16 = vld [vmem:[#allocation5 + $0x18] sm:$0xff] }
  0x11   :  { %496 = vmatpush.bf16.msra.mxu0 %v857_v4  ;;  %v863_v13 = vld [vmem:[#allocation5 + $0x60] sm:$0xff]  ;;  %v862_v17 = vld [vmem:[#allocation5 + $0x58] sm:$0xff]  ;;  %v853_v20 = vld [vmem:[#allocation5 + $0x10] sm:$0xff] }
  0x12   :  { %514 = vmatpush.bf16.msra.mxu1 %v865_v5  ;;  %v871_v14 = vld [vmem:[#allocation5 + $0xa0] sm:$0xff]  ;;  %v870_v18 = vld [vmem:[#allocation5 + $0x98] sm:$0xff]  ;;  %v861_v21 = vld [vmem:[#allocation5 + $0x50] sm:$0xff] }
  0x13   :  { %532 = vmatpush.bf16.msra.mxu2 %v873_v6  ;;  %v879_v15 = vld [vmem:[#allocation5 + $0xe0] sm:$0xff]  ;;  %v878_v19 = vld [vmem:[#allocation5 + $0xd8] sm:$0xff]  ;;  %v869_v22 = vld [vmem:[#allocation5 + $0x90] sm:$0xff] }
  0x14   :  { %550 = vmatpush.bf16.msra.mxu3 %v881_v7  ;;  %v877_v23 = vld [vmem:[#allocation5 + $0xd0] sm:$0xff]  ;;  %v852_v24 = vld [vmem:[#allocation5 + $0x8] sm:$0xff]  ;;  %v851_v28 = vld [vmem:[#allocation5] sm:$0xff] }
  0x15   :  { %497 = vmatpush.bf16.msra.mxu0 %v856_v8  ;;  %v860_v25 = vld [vmem:[#allocation5 + $0x48] sm:$0xff]  ;;  %v859_v29 = vld [vmem:[#allocation5 + $0x40] sm:$0xff]  ;;  %v631_v32 = vld [vmem:[#allocation2] sm:$0xf] }
  0x16   :  { %515 = vmatpush.bf16.msra.mxu1 %v864_v9  ;;  %v868_v26 = vld [vmem:[#allocation5 + $0x88] sm:$0xff]  ;;  %v867_v30 = vld [vmem:[#allocation5 + $0x80] sm:$0xff]  ;;  %v848_v33 = vld [vmem:[#allocation2 + $0x14] sm:$0xf0] }
  0x17   :  { %533 = vmatpush.bf16.msra.mxu2 %v872_v10  ;;  %v876_v27 = vld [vmem:[#allocation5 + $0xc8] sm:$0xff]  ;;  %v875_v31 = vld [vmem:[#allocation5 + $0xc0] sm:$0xff]  ;;  %v845_v34 = vld [vmem:[#allocation2 + $0x4] sm:$0xf]  ;;  %v632_v41 = vor.u32 %v848_v33, %v631_v32 }
  0x18   :  { %551 = vmatpush.bf16.msra.mxu3 %v880_v11  ;;  %v633_v35 = vld [vmem:[#allocation2 + $0x18] sm:$0xf0]  ;;  %v639_v36 = vld [vmem:[#allocation2 + $0x8] sm:$0xf]  ;;  %v849_v37 = vld [vmem:[#allocation2 + $0x1c] sm:$0xf0] }
  0x19   :  { %498 = vmatpush.bf16.msra.mxu0 %v855_v12  ;;  %v846_v38 = vld [vmem:[#allocation2 + $0xc] sm:$0xf]  ;;  %v641_v39 = vld [vmem:[#allocation2 + $0x20] sm:$0xf0]  ;;  %v636_v42 = vor.u32 %v845_v34, %v633_v35  ;;  %v640_v43 = vor.u32 %v849_v37, %v639_v36  ;;  %v889_v46 = vld [vmem:[#allocation5 + $0x130] sm:$0xff] }
  0x1a   :  { %516 = vmatpush.bf16.msra.mxu1 %v863_v13  ;;  %v890_v40 = vld [vmem:[#allocation5 + $0x138] sm:$0xff]  ;;  %v644_v44 = vor.u32 %v846_v38, %v641_v39  ;;  %v897_v47 = vld [vmem:[#allocation5 + $0x170] sm:$0xff]  ;;  %v888_v48 = vld [vmem:[#allocation5 + $0x128] sm:$0xff] }
  0x1b   :  { %534 = vmatpush.bf16.msra.mxu2 %v871_v14  ;;  %v898_v45 = vld [vmem:[#allocation5 + $0x178] sm:$0xff]  ;;  %v53_v49 = vld [vmem:[#allocation2 + $0x30] sm:$0xff]  ;;  %v54_v51 = vld [vmem:[#allocation2 + $0x38] sm:$0xff] }
  0x1c   :  { %552 = vmatpush.bf16.msra.mxu3 %v879_v15  ;;  %v896_v50 = vld [vmem:[#allocation5 + $0x168] sm:$0xff]  ;;  %v887_v52 = vld [vmem:[#allocation5 + $0x120] sm:$0xff]  ;;  %v177_v53 = vunpack.c.l.b16 %v53_v49  ;;  %v178_v54 = vunpack.c.h.b16 %v53_v49  ;;  %v179_v55 = vunpack.c.l.b16 %v54_v51  ;;  %v180_v56 = vunpack.c.h.b16 %v54_v51  ;;  %v886_v58 = vld [vmem:[#allocation5 + $0x118] sm:$0xff] }
  0x1d   :  { %499 = vmatpush.bf16.msra.mxu0 %v854_v16  ;;  %v895_v57 = vld [vmem:[#allocation5 + $0x160] sm:$0xff]  ;;  %v894_v63 = vld [vmem:[#allocation5 + $0x158] sm:$0xff]  ;;  %v885_v0 = vld [vmem:[#allocation5 + $0x110] sm:$0xff] }
  0x1e   :  { %517 = vmatpush.bf16.msra.mxu1 %v862_v17  ;;  %v189_v59 = vpack.c.b16 %v177_v53, %v177_v53  ;;  %v190_v60 = vpack.c.b16 %v178_v54, %v178_v54  ;;  %v191_v61 = vpack.c.b16 %v179_v55, %v179_v55  ;;  %v192_v62 = vpack.c.b16 %v180_v56, %v180_v56  ;;  %v893_v1 = vld [vmem:[#allocation5 + $0x150] sm:$0xff]  ;;  %v884_v2 = vld [vmem:[#allocation5 + $0x108] sm:$0xff]  ;;  %v55_v4 = vld [vmem:[#allocation2 + $0x40] sm:$0xff] }
  0x1f   :  { %535 = vmatpush.bf16.msra.mxu2 %v870_v18  ;;  %v892_v3 = vld [vmem:[#allocation5 + $0x148] sm:$0xff]  ;;  %v883_v5 = vld [vmem:[#allocation5 + $0x100] sm:$0xff]  ;;  %v181_v8 = vunpack.c.l.b16 %v55_v4  ;;  %v182_v12 = vunpack.c.h.b16 %v55_v4 }
  0x20   :  { %553 = vmatpush.bf16.msra.mxu3 %v878_v19  ;;  %v647_v6 = vld [vmem:[#allocation2 + $0x10] sm:$0xf]  ;;  %v850_v7 = vld [vmem:[#allocation2 + $0x24] sm:$0xf0]  ;;  %v847_v10 = vld [vmem:[#allocation2 + $0x14] sm:$0xf] }
  0x21   :  { %500 = vmatpush.bf16.msra.mxu0 %v853_v20  ;;  %v891_v9 = vld [vmem:[#allocation5 + $0x140] sm:$0xff]  ;;  %v648_v13 = vor.u32 %v850_v7, %v647_v6  ;;  %v193_v14 = vpack.c.b16 %v181_v8, %v181_v8  ;;  %v194_v16 = vpack.c.b16 %v182_v12, %v182_v12 }
  0x22   :  { %518 = vmatpush.bf16.msra.mxu1 %v861_v21  ;;  %v649_v11 = vld [vmem:[#allocation2 + $0x28] sm:$0xf0] }
  0x23   :  { %536 = vmatpush.bf16.msra.mxu2 %v869_v22  ;;  %v652_v15 = vor.u32 %v847_v10, %v649_v11 }
  0x24   :  { %554 = vmatpush.bf16.msra.mxu3 %v877_v23 }
  0x25   :  { %501 = vmatpush.bf16.msra.mxu0 %v852_v24 }
  0x26   :  { %519 = vmatpush.bf16.msra.mxu1 %v860_v25 }
  0x27   :  { %537 = vmatpush.bf16.msra.mxu2 %v868_v26 }
  0x28   :  { %555 = vmatpush.bf16.msra.mxu3 %v876_v27  ;;  %v927_v27 = vld [vmem:[%s1053_s2] ss:$0 sm:$0xff]  ;;  %s1012_s2 = smov [#allocation7]  }
  0x29   :  { %502 = vmatpush.bf16.msra.mxu0 %v851_v28  ;;  %s613_s26 = sshll.u32 %s1012_s2, 4  ;;  %s614_s26 = int_to_ptr.vmem [resolvable:$true] %s613_s26 }
  0x2a   :  { %520 = vmatpush.bf16.msra.mxu1 %v859_v29 }
  0x2b   :  { %538 = vmatpush.bf16.msra.mxu2 %v867_v30 }
  0x2c   :  { %556 = vmatpush.bf16.msra.mxu3 %v875_v31  ;;  %503 = vmatmul.bf16.vlgmr.msra.gmra.mxu0 %v632_v41 }
  0x2d   :  { %567 = vmatpush.bf16.msrb.mxu0 %v890_v40  ;;  %521 = vmatmul.bf16.vlgmr.msra.gmra.mxu1 %v636_v42 }
  0x2e   :  { %539 = vmatmul.bf16.vlgmr.msra.gmra.mxu2 %v640_v43  ;;  %585 = vmatpush.bf16.msrb.mxu1 %v898_v45 }
  0x2f   :  { %904 = vmatpush.bf16.msrb.mxu2 %v890_v40  ;;  %557 = vmatmul.bf16.vlgmr.msra.gmra.mxu3 %v644_v44 }
  0x30   :  { %912 = vmatpush.bf16.msrb.mxu3 %v898_v45 }
  0x31   :  { %568 = vmatpush.bf16.msrb.mxu0 %v889_v46 }
  0x32   :  { %586 = vmatpush.bf16.msrb.mxu1 %v897_v47 }
  0x33   :  { %905 = vmatpush.bf16.msrb.mxu2 %v889_v46 }
  0x34   :  { %913 = vmatpush.bf16.msrb.mxu3 %v897_v47 }
  0x35   :  { %569 = vmatpush.bf16.msrb.mxu0 %v888_v48 }
  0x36   :  { %587 = vmatpush.bf16.msrb.mxu1 %v896_v50 }
  0x37   :  { %906 = vmatpush.bf16.msrb.mxu2 %v888_v48 }
  0x38   :  { %914 = vmatpush.bf16.msrb.mxu3 %v896_v50 }
  0x39   :  { %570 = vmatpush.bf16.msrb.mxu0 %v887_v52 }
  0x3a   :  { %588 = vmatpush.bf16.msrb.mxu1 %v895_v57 }
  0x3b   :  { %907 = vmatpush.bf16.msrb.mxu2 %v887_v52 }
  0x3c   :  { %915 = vmatpush.bf16.msrb.mxu3 %v895_v57  ;;  %508 = vmatmul.bf16.gmra.mxu0 %v189_v59 }
  0x3d   :  { %571 = vmatpush.bf16.msrb.mxu0 %v886_v58  ;;  %526 = vmatmul.bf16.gmra.mxu1 %v190_v60 }
  0x3e   :  { %544 = vmatmul.bf16.gmra.mxu2 %v191_v61  ;;  %589 = vmatpush.bf16.msrb.mxu1 %v894_v63 }
  0x3f   :  { %908 = vmatpush.bf16.msrb.mxu2 %v886_v58  ;;  %562 = vmatmul.bf16.gmra.mxu3 %v192_v62 }
  0x40   :  { %916 = vmatpush.bf16.msrb.mxu3 %v894_v63 }
  0x41   :  { %572 = vmatpush.bf16.msrb.mxu0 %v885_v0 }
  0x42   :  { %590 = vmatpush.bf16.msrb.mxu1 %v893_v1 }
  0x43   :  { %909 = vmatpush.bf16.msrb.mxu2 %v885_v0 }
  0x44   :  { %917 = vmatpush.bf16.msrb.mxu3 %v893_v1 }
  0x45   :  { %573 = vmatpush.bf16.msrb.mxu0 %v884_v2 }
  0x46   :  { %591 = vmatpush.bf16.msrb.mxu1 %v892_v3 }
  0x47   :  { %910 = vmatpush.bf16.msrb.mxu2 %v884_v2 }
  0x48   :  { %918 = vmatpush.bf16.msrb.mxu3 %v892_v3 }
  0x49   :  { %574 = vmatpush.bf16.msrb.mxu0 %v883_v5 }
  0x4a   :  { %592 = vmatpush.bf16.msrb.mxu1 %v891_v9 }
  0x4b   :  { %911 = vmatpush.bf16.msrb.mxu2 %v883_v5 }
  0x4c   :  { %919 = vmatpush.bf16.msrb.mxu3 %v891_v9  ;;  %575 = vmatmul.bf16.vlgmr.msrb.gmra.mxu0 %v648_v13 }
  0x4d   :  { %593 = vmatmul.bf16.vlgmr.msrb.gmra.mxu1 %v652_v15 }
  0x4e   :  { %580 = vmatmul.bf16.vlgmr.msrb.gmra.mxu2 %v193_v14 }
  0x4f   :  { %598 = vmatmul.bf16.vlgmr.msrb.gmra.mxu3 %v194_v16 }
  0xa9   :  { %v504_v17 = vpop.f32.mrf.mxu0 }
  0xaa   :  { %v522_v18 = vpop.f32.mrf.mxu1  ;;  %v505_v32 = vadd.f32 %v927_v27, %v504_v17 }
  0xac   :  { %v523_v35 = vadd.f32 %v522_v18, %v505_v32 }
  0xb1   :  { %v540_v19 = vpop.f32.mrf.mxu2  ;;  %v506_v21 = vpop.f32.mrf.mxu0 }
  0xb2   :  { %v558_v20 = vpop.f32.mrf.mxu3  ;;  %v524_v22 = vpop.f32.mrf.mxu1  ;;  %v507_v34 = vadd.f32 %v927_v27, %v506_v21  ;;  %v541_v40 = vadd.f32 %v540_v19, %v523_v35 }
  0xb4   :  { %v525_v41 = vadd.f32 %v524_v22, %v507_v34  ;;  %v559_v45 = vadd.f32 %v558_v20, %v541_v40 }
  0xb9   :  { %v542_v23 = vpop.f32.mrf.mxu2  ;;  %v509_v25 = vpop.f32.mrf.mxu0 }
  0xba   :  { %v560_v24 = vpop.f32.mrf.mxu3  ;;  %v527_v26 = vpop.f32.mrf.mxu1  ;;  %v510_v33 = vadd.f32 %v927_v27, %v509_v25  ;;  %v543_v44 = vadd.f32 %v542_v23, %v525_v41 }
  0xbc   :  { %v528_v38 = vadd.f32 %v527_v26, %v510_v33  ;;  %v561_v47 = vadd.f32 %v560_v24, %v543_v44 }
  0xc1   :  { %v545_v28 = vpop.f32.mrf.mxu2  ;;  %v511_v30 = vpop.f32.mrf.mxu0 }
  0xc2   :  { %v563_v29 = vpop.f32.mrf.mxu3  ;;  %v529_v31 = vpop.f32.mrf.mxu1  ;;  %v546_v43 = vadd.f32 %v545_v28, %v528_v38 }
  0xc4   :  { %v564_v46 = vadd.f32 %v563_v29, %v546_v43 }
  0xc9   :  { %v547_v36 = vpop.f32.mrf.mxu2  ;;  %v576_v39 = vpop.f32.mrf.mxu0 }
  0xca   :  { %v565_v37 = vpop.f32.mrf.mxu3  ;;  %v594_v42 = vpop.f32.mrf.mxu1  ;;  %v577_v48 = vadd.f32 %v576_v39, %v559_v45 }
  0xcc   :  { %v595_v56 = vadd.f32 %v594_v42, %v577_v48 }
  0xd1   :  { %v581_v49 = vpop.f32.mrf.mxu2  ;;  %v578_v52 = vpop.f32.mrf.mxu0 }
  0xd2   :  { %v582_v50 = vadd.f32 %v581_v49, %v564_v46  ;;  %v599_v51 = vpop.f32.mrf.mxu3  ;;  %v579_v53 = vadd.f32 %v578_v52, %v561_v47  ;;  %v596_v55 = vpop.f32.mrf.mxu1 }
  0xd4   :  { %v600_v54 = vadd.f32 %v599_v51, %v582_v50  ;;  %v597_v57 = vadd.f32 %v596_v55, %v579_v53 }
  0xd6   :  { %v605_v58 = vpack.c.bf16 %v600_v54, %v600_v54  ;;  %v902_v59 = vpack.c.bf16 %v597_v57, %v595_v56 }
  0xd8   :  { %608 = vst [vmem:[#allocation7 + $0x8] sm:$0xf] %v605_v58 }
  0xd9   :  { %903 = vst [vmem:[#allocation7] sm:$0xff] %v902_v59   ;;  %v583_v60 = vpop.f32.mrf.mxu2 }
  0xda   :  { %v601_v61 = vpop.f32.mrf.mxu3  ;;  %621 = dma.vmem_to_hbm [thread:$0]  %s614_s26, 192, %s616_s29, [#allocation4], %s1010_s24, %s1010_s24, %s1011_s25  }
  0xdb   :  { %1004 = dma.done.wait [#allocation4], 192  }
  0xdc   :  { %1005 = vsyncadd [#allocation4], 4294967104 }
  0xdd   :  { %626 = vsyncpa [#allocation3], 1 }
  0xde   :  { %627 = vsyncpa [#allocation6], 1 }
  0xdf   :  { %628 = vsyncpa [#allocation4], 1 }

</bundles_post_ra>
